<compile_context>
chip_gen: v7x
topology: tpu7x:2x2x1
jax: 0.10.0
libtpu: 0.0.40
codegen_flags: <defaults>
</compile_context>

<pallas_src>
import functools
import numpy as np
import jax
import jax.numpy as jnp
from jax.experimental import pallas as pl
from jax.experimental.pallas import tpu as pltpu


# ----------------------------------------------------------------------------
# Kernel: fused (predictor | target) 3-layer MLP on one x row tile.
# ----------------------------------------------------------------------------
def _fused_mlp3_kernel(x_ref, w1_ref, b1_ref, w2_ref, b2_ref, w3_ref, b3_ref, o_ref):
    # x: (TM, F) f32 (cast to bf16 on the VPU, hidden under the DMA);
    # w1: (F, 2D) bf16; w2/w3: (2D, 2D) bf16 block-diagonal; biases: (1, 2D) f32.
    # MXU matmuls with f32 accumulation; bias-add in f32; one bf16 cast per
    # layer; ReLU on the bf16 activation (identical numerics, fewer VALU ops).
    x = x_ref[...].astype(jnp.bfloat16)

    h1 = jnp.dot(x, w1_ref[...], preferred_element_type=jnp.float32) + b1_ref[...]
    h1 = jnp.maximum(h1.astype(jnp.bfloat16), 0)

    h2 = jnp.dot(h1, w2_ref[...], preferred_element_type=jnp.float32) + b2_ref[...]
    h2 = jnp.maximum(h2.astype(jnp.bfloat16), 0)

    o_ref[...] = (
        jnp.dot(h2, w3_ref[...], preferred_element_type=jnp.float32) + b3_ref[...]
    )


def fused_rnd_pallas(x, fused_params, *, tm=4096):
    """Run the fused predictor|target MLP in one gridded Pallas call.

    x: (N, F) f32.  Returns (N, 2D) f32; cols [:D] = predictor, [D:] = target.
    """
    w1, b1, w2, b2, w3, b3 = fused_params
    n, f = x.shape
    d2 = w3.shape[1]

    # Row tile: multiple of 8; no larger than the (8-rounded) batch.
    rows8 = max(8, -(-n // 8) * 8)
    tm_eff = min(tm, rows8)
    # v7x megacore: if one tile would swallow a large batch, split into two
    # 8-aligned tiles so the "parallel" row axis has work for both TCs.
    if tm_eff == rows8 and rows8 >= 1024:
        tm_eff = -(-rows8 // 16) * 8

    grid = (pl.cdiv(n, tm_eff),)   # ragged last block: masked boundary stores

    out = pl.pallas_call(
        _fused_mlp3_kernel,
        out_shape=jax.ShapeDtypeStruct((n, d2), jnp.float32),
        grid_spec=pltpu.PrefetchScalarGridSpec(
            num_scalar_prefetch=0,
            grid=grid,
            in_specs=[
                pl.BlockSpec((tm_eff, f), lambda i: (i, 0)),   # x tile (f32)
                pl.BlockSpec((f, d2), lambda i: (0, 0)),       # W1 (VMEM-resident)
                pl.BlockSpec((1, d2), lambda i: (0, 0)),       # b1
                pl.BlockSpec((d2, d2), lambda i: (0, 0)),      # W2 (block-diag)
                pl.BlockSpec((1, d2), lambda i: (0, 0)),       # b2
                pl.BlockSpec((d2, d2), lambda i: (0, 0)),      # W3 (block-diag)
                pl.BlockSpec((1, d2), lambda i: (0, 0)),       # b3
            ],
            out_specs=pl.BlockSpec((tm_eff, d2), lambda i: (i, 0)),
        ),
        compiler_params=pltpu.CompilerParams(
            dimension_semantics=("parallel",),   # megacore / v7x 2-TC sharding
            vmem_limit_bytes=32 << 20,           # TM=4096 (~11 MiB) + headroom,
        ),                                       # safe on v5e/v6e/v7x alike
    )(x, w1, b1, w2, b2, w3, b3)
    return out


# ----------------------------------------------------------------------------
# Parameter construction (matches nn.init.orthogonal_(W, sqrt(2)), zero bias).
# ----------------------------------------------------------------------------
def _orthogonal(key, shape, gain):
    init = jax.nn.initializers.orthogonal(scale=gain)
    return init(key, shape, jnp.float32)


def make_linear_params(key, in_dim, out_dim, gain=np.sqrt(2.0)):
    # PyTorch Linear weight is (out, in); store transposed (in, out) so the
    # kernel computes x @ W + b.  Bias kept 2D (1, out) for VMEM layout.
    w = _orthogonal(key, (out_dim, in_dim), gain).T
    b = jnp.zeros((1, out_dim), jnp.float32)
    return w, b


def make_mlp_params(key, in_dim, hidden_dim):
    k1, k2, k3 = jax.random.split(key, 3)
    return (
        make_linear_params(k1, in_dim, hidden_dim),
        make_linear_params(k2, hidden_dim, hidden_dim),
        make_linear_params(k3, hidden_dim, hidden_dim),
    )


def fuse_rnd_params(pred_params, targ_params):
    """Fuse predictor/target heads: concat layer-1, block-diag layers 2-3.

    Column convention: [:D] = predictor, [D:] = target.  Weights cast to bf16
    for the MXU; biases stay f32 (added post-accumulation).
    """
    (pw1, pb1), (pw2, pb2), (pw3, pb3) = pred_params
    (tw1, tb1), (tw2, tb2), (tw3, tb3) = targ_params
    d = pw1.shape[1]
    z = jnp.zeros((d, d), jnp.float32)

    w1 = jnp.concatenate([pw1, tw1], axis=1)          # (F, 2D)
    b1 = jnp.concatenate([pb1, tb1], axis=1)          # (1, 2D)
    w2 = jnp.block([[pw2, z], [z, tw2]])              # (2D, 2D)
    b2 = jnp.concatenate([pb2, tb2], axis=1)
    w3 = jnp.block([[pw3, z], [z, tw3]])
    b3 = jnp.concatenate([pb3, tb3], axis=1)

    return (
        w1.astype(jnp.bfloat16), b1,
        w2.astype(jnp.bfloat16), b2,
        w3.astype(jnp.bfloat16), b3,
    )


# ----------------------------------------------------------------------------
# Module forward: reshape(-1, input_shape) -> fused heads -> split columns.
# ----------------------------------------------------------------------------
def random_network_forward(inputs, input_shape, fused_params, d_out):
    # x stays f32; the bf16 cast happens on the VPU inside the kernel.
    x = jnp.reshape(inputs, (-1, input_shape)).astype(jnp.float32)
    out = fused_rnd_pallas(x, fused_params)
    predict_feature = out[:, :d_out]
    target_feature = out[:, d_out:]
    return predict_feature, target_feature


# ----------------------------------------------------------------------------
# Pure-JAX references.
# ----------------------------------------------------------------------------
def _mlp3_ref_bf16(x, params):
    # Precision-matched reference: bf16 operands, f32 accumulation.
    (w1, b1), (w2, b2), (w3, b3) = params

    def lin(h, w, b):
        return jnp.dot(h.astype(jnp.bfloat16), w.astype(jnp.bfloat16),
                       preferred_element_type=jnp.float32) + b

    h1 = jnp.maximum(lin(x, w1, b1), 0.0)
    h2 = jnp.maximum(lin(h1, w2, b2), 0.0)
    return lin(h2, w3, b3)


def _mlp3_ref_f32(x, params):
    (w1, b1), (w2, b2), (w3, b3) = params
    h1 = jnp.maximum(x @ w1 + b1, 0.0)
    h2 = jnp.maximum(h1 @ w2 + b2, 0.0)
    return h2 @ w3 + b3


def _check(pred, targ, x_flat, predictor_params, target_params):
    ref_pred = _mlp3_ref_bf16(x_flat, predictor_params)
    ref_targ = _mlp3_ref_bf16(x_flat, target_params)
    np.testing.assert_allclose(np.asarray(pred), np.asarray(ref_pred),
                               rtol=1e-3, atol=1e-3)
    np.testing.assert_allclose(np.asarray(targ), np.asarray(ref_targ),
                               rtol=1e-3, atol=1e-3)
    # Sanity vs the full-f32 module semantics (loose: bf16 MXU operands).
    ref_pred_f32 = _mlp3_ref_f32(x_flat, predictor_params)
    ref_targ_f32 = _mlp3_ref_f32(x_flat, target_params)
    np.testing.assert_allclose(np.asarray(pred), np.asarray(ref_pred_f32),
                               rtol=1e-1, atol=1e-1)
    np.testing.assert_allclose(np.asarray(targ), np.asarray(ref_targ_f32),
                               rtol=1e-1, atol=1e-1)


if __name__ == "__main__":
    # Small, module-consistent config (non-CNN path):
    #   input_shape = 32, RANDOM_NETWORK_DIM = 64  -> fused width 128 (lane-dense)
    INPUT_SHAPE = 32
    RANDOM_NETWORK_DIM = 64
    BATCH = 8

    key = jax.random.PRNGKey(0)
    k_pred, k_targ, k_x, k_x2 = jax.random.split(key, 4)

    predictor_params = make_mlp_params(k_pred, INPUT_SHAPE, RANDOM_NETWORK_DIM)
    target_params = make_mlp_params(k_targ, INPUT_SHAPE, RANDOM_NETWORK_DIM)
    fused_params = fuse_rnd_params(predictor_params, target_params)

    fwd = jax.jit(
        functools.partial(
            random_network_forward,
            input_shape=INPUT_SHAPE,
            fused_params=fused_params,
            d_out=RANDOM_NETWORK_DIM,
        )
    )

    # Case 1: (batch, agents, obs) flattened to 16 rows (8-aligned).
    inputs = jax.random.normal(k_x, (BATCH, 2, INPUT_SHAPE), jnp.float32)
    predict_feature, target_feature = fwd(inputs)
    jax.block_until_ready((predict_feature, target_feature))
    x_flat = jnp.reshape(inputs, (-1, INPUT_SHAPE)).astype(jnp.float32)
    _check(predict_feature, target_feature, x_flat, predictor_params, target_params)
    assert predict_feature.shape == (BATCH * 2, RANDOM_NETWORK_DIM)
    assert target_feature.shape == (BATCH * 2, RANDOM_NETWORK_DIM)

    # Case 2: ragged row count (9 rows) exercises the masked boundary block
    # that replaced the pad / slice round trips.
    inputs2 = jax.random.normal(k_x2, (3, 3, INPUT_SHAPE), jnp.float32)
    pf2, tf2 = fwd(inputs2)
    jax.block_until_ready((pf2, tf2))
    x_flat2 = jnp.reshape(inputs2, (-1, INPUT_SHAPE)).astype(jnp.float32)
    _check(pf2, tf2, x_flat2, predictor_params, target_params)
    assert pf2.shape == (9, RANDOM_NETWORK_DIM)
    assert tf2.shape == (9, RANDOM_NETWORK_DIM)

    print("KERNEL_OK")
</pallas_src>

<mosaic_0001>
module attributes {stable_mosaic.version = 11 : i64} {
  func.func @_fused_mlp3_kernel(%arg0: i32, %arg1: memref<16x32xf32, #tpu.memory_space<vmem>>, %arg2: memref<32x128xbf16, #tpu.memory_space<vmem>>, %arg3: memref<1x128xf32, #tpu.memory_space<vmem>>, %arg4: memref<128x128xbf16, #tpu.memory_space<vmem>>, %arg5: memref<1x128xf32, #tpu.memory_space<vmem>>, %arg6: memref<128x128xbf16, #tpu.memory_space<vmem>>, %arg7: memref<1x128xf32, #tpu.memory_space<vmem>>, %arg8: memref<16x128xf32, #tpu.memory_space<vmem>>) attributes {dimension_semantics = [#tpu.dimension_semantics<parallel>], iteration_bounds = array<i64: 1>, scalar_prefetch = 0 : i64, scratch_operands = 0 : i64, tpu.core_type = #tpu.core_type<tc>, window_params = [{transform_indices = @transform_0, window_bounds = array<i64: 16, 32>}, {pipeline_mode = #tpu.pipeline_mode<synchronous>, transform_indices = @transform_1, window_bounds = array<i64: 32, 128>}, {pipeline_mode = #tpu.pipeline_mode<synchronous>, transform_indices = @transform_2, window_bounds = array<i64: 1, 128>}, {pipeline_mode = #tpu.pipeline_mode<synchronous>, transform_indices = @transform_3, window_bounds = array<i64: 128, 128>}, {pipeline_mode = #tpu.pipeline_mode<synchronous>, transform_indices = @transform_4, window_bounds = array<i64: 1, 128>}, {pipeline_mode = #tpu.pipeline_mode<synchronous>, transform_indices = @transform_5, window_bounds = array<i64: 128, 128>}, {pipeline_mode = #tpu.pipeline_mode<synchronous>, transform_indices = @transform_6, window_bounds = array<i64: 1, 128>}, {transform_indices = @transform_7, window_bounds = array<i64: 16, 128>}]} {
    %c0 = arith.constant 0 : index
    %c0_0 = arith.constant 0 : index
    %0 = vector.load %arg1[%c0, %c0_0] : memref<16x32xf32, #tpu.memory_space<vmem>>, vector<16x32xf32>
    %1 = arith.truncf %0 : vector<16x32xf32> to vector<16x32xbf16>
    %c0_1 = arith.constant 0 : index
    %c0_2 = arith.constant 0 : index
    %2 = vector.load %arg2[%c0_1, %c0_2] : memref<32x128xbf16, #tpu.memory_space<vmem>>, vector<32x128xbf16>
    %cst = arith.constant dense<0.000000e+00> : vector<16x128xf32>
    %3 = tpu.matmul %1, %2, %cst {dimension_numbers = #tpu.dot_dimension_numbers<[1], [0], [0], [1], [0, 0, 1, 1], [], []>} : vector<16x32xbf16>, vector<32x128xbf16>, vector<16x128xf32> -> vector<16x128xf32>
    %c0_3 = arith.constant 0 : index
    %c0_4 = arith.constant 0 : index
    %4 = vector.load %arg3[%c0_3, %c0_4] : memref<1x128xf32, #tpu.memory_space<vmem>>, vector<1x128xf32>
    %5 = vector.broadcast %4 : vector<1x128xf32> to vector<16x128xf32>
    %6 = arith.addf %3, %5 : vector<16x128xf32>
    %7 = arith.truncf %6 : vector<16x128xf32> to vector<16x128xbf16>
    %cst_5 = arith.constant 0.000000e+00 : bf16
    %8 = vector.broadcast %cst_5 : bf16 to vector<16x128xbf16>
    %9 = arith.maximumf %7, %8 : vector<16x128xbf16>
    %c0_6 = arith.constant 0 : index
    %c0_7 = arith.constant 0 : index
    %10 = vector.load %arg4[%c0_6, %c0_7] : memref<128x128xbf16, #tpu.memory_space<vmem>>, vector<128x128xbf16>
    %cst_8 = arith.constant dense<0.000000e+00> : vector<16x128xf32>
    %11 = tpu.matmul %9, %10, %cst_8 {dimension_numbers = #tpu.dot_dimension_numbers<[1], [0], [0], [1], [0, 0, 1, 1], [], []>} : vector<16x128xbf16>, vector<128x128xbf16>, vector<16x128xf32> -> vector<16x128xf32>
    %c0_9 = arith.constant 0 : index
    %c0_10 = arith.constant 0 : index
    %12 = vector.load %arg5[%c0_9, %c0_10] : memref<1x128xf32, #tpu.memory_space<vmem>>, vector<1x128xf32>
    %13 = vector.broadcast %12 : vector<1x128xf32> to vector<16x128xf32>
    %14 = arith.addf %11, %13 : vector<16x128xf32>
    %15 = arith.truncf %14 : vector<16x128xf32> to vector<16x128xbf16>
    %cst_11 = arith.constant 0.000000e+00 : bf16
    %16 = vector.broadcast %cst_11 : bf16 to vector<16x128xbf16>
    %17 = arith.maximumf %15, %16 : vector<16x128xbf16>
    %c0_12 = arith.constant 0 : index
    %c0_13 = arith.constant 0 : index
    %18 = vector.load %arg6[%c0_12, %c0_13] : memref<128x128xbf16, #tpu.memory_space<vmem>>, vector<128x128xbf16>
    %cst_14 = arith.constant dense<0.000000e+00> : vector<16x128xf32>
    %19 = tpu.matmul %17, %18, %cst_14 {dimension_numbers = #tpu.dot_dimension_numbers<[1], [0], [0], [1], [0, 0, 1, 1], [], []>} : vector<16x128xbf16>, vector<128x128xbf16>, vector<16x128xf32> -> vector<16x128xf32>
    %c0_15 = arith.constant 0 : index
    %c0_16 = arith.constant 0 : index
    %20 = vector.load %arg7[%c0_15, %c0_16] : memref<1x128xf32, #tpu.memory_space<vmem>>, vector<1x128xf32>
    %21 = vector.broadcast %20 : vector<1x128xf32> to vector<16x128xf32>
    %22 = arith.addf %19, %21 : vector<16x128xf32>
    %c0_17 = arith.constant 0 : index
    %c0_18 = arith.constant 0 : index
    %23 = vector.load %arg8[%c0_17, %c0_18] : memref<16x128xf32, #tpu.memory_space<vmem>>, vector<16x128xf32>
    tpu.vector_store %arg8[%c0_17, %c0_18], %22 {strides = array<i32>} : memref<16x128xf32, #tpu.memory_space<vmem>>, vector<16x128xf32>,
    return
  }
  func.func @transform_0(%arg0: i32) -> (i32, i32) {
    %c0_i32 = arith.constant 0 : i32
    %c0_i32_0 = arith.constant 0 : i32
    return %arg0, %c0_i32 : i32, i32
  }
  func.func @transform_1(%arg0: i32) -> (i32, i32) {
    %c0_i32 = arith.constant 0 : i32
    %c0_i32_0 = arith.constant 0 : i32
    %c0_i32_1 = arith.constant 0 : i32
    return %c0_i32, %c0_i32_0 : i32, i32
  }
  func.func @transform_2(%arg0: i32) -> (i32, i32) {
    %c0_i32 = arith.constant 0 : i32
    %c0_i32_0 = arith.constant 0 : i32
    %c0_i32_1 = arith.constant 0 : i32
    return %c0_i32, %c0_i32_0 : i32, i32
  }
  func.func @transform_3(%arg0: i32) -> (i32, i32) {
    %c0_i32 = arith.constant 0 : i32
    %c0_i32_0 = arith.constant 0 : i32
    %c0_i32_1 = arith.constant 0 : i32
    return %c0_i32, %c0_i32_0 : i32, i32
  }
  func.func @transform_4(%arg0: i32) -> (i32, i32) {
    %c0_i32 = arith.constant 0 : i32
    %c0_i32_0 = arith.constant 0 : i32
    %c0_i32_1 = arith.constant 0 : i32
    return %c0_i32, %c0_i32_0 : i32, i32
  }
  func.func @transform_5(%arg0: i32) -> (i32, i32) {
    %c0_i32 = arith.constant 0 : i32
    %c0_i32_0 = arith.constant 0 : i32
    %c0_i32_1 = arith.constant 0 : i32
    return %c0_i32, %c0_i32_0 : i32, i32
  }
  func.func @transform_6(%arg0: i32) -> (i32, i32) {
    %c0_i32 = arith.constant 0 : i32
    %c0_i32_0 = arith.constant 0 : i32
    %c0_i32_1 = arith.constant 0 : i32
    return %c0_i32, %c0_i32_0 : i32, i32
  }
  func.func @transform_7(%arg0: i32) -> (i32, i32) {
    %c0_i32 = arith.constant 0 : i32
    %c0_i32_0 = arith.constant 0 : i32
    return %arg0, %c0_i32 : i32, i32
  }
}

</mosaic_0001>

<bundles_post_ra>
// kernel: random_network_forward.1
= control target key start
LH: loop header
LB: loop body
LE: loop exit
PB: predicated region body
PF: predicated region fallthrough
CT: control target
= control target key end

     0   :  { %12 = vsyncpa [#allocation3], 0  ;;  %s707_s0 = inlined_call_operand.vmem [shape: f32[16,32], index: 0, kind: input, shape index: {}]   ;;  %s708_s1 = inlined_call_operand.hbm [shape: bf16[32,128], index: 1, kind: input, shape index: {}]   ;;  %s709_s2 = inlined_call_operand.vmem [shape: f32[1,128], index: 2, kind: input, shape index: {}, may-alias: {2,4,6}]   ;;  %s710_s3 = inlined_call_operand.hbm [shape: bf16[128,128], index: 3, kind: input, shape index: {}]   ;;  %s711_s4 = inlined_call_operand.vmem [shape: f32[1,128], index: 4, kind: input, shape index: {}, may-alias: {2,4,6}]   ;;  %s712_s5 = inlined_call_operand.hbm [shape: bf16[128,128], index: 5, kind: input, shape index: {}]   ;;  %s713_s6 = inlined_call_operand.vmem [shape: f32[1,128], index: 6, kind: input, shape index: {}, may-alias: {2,4,6}]   ;;  %s714_s7 = inlined_call_operand.vmem [shape: f32[16,128], index: 7, kind: output, shape index: {}]  }
   0x1   :  { %13 = vsyncpa [#allocation5], 0  ;;  %s562_s24 = smov [#allocation4]   ;;  %s563_s26 = smov [#allocation2]  }
   0x2   :  { %s35_s25 = sshll.u32 %s562_s24, 4  ;;  %s21_s27 = sshll.u32 %s563_s26, 4  ;;  %s36_s25 = int_to_ptr.vmem [resolvable:$true] %s35_s25  ;;  %s610_s27 = int_to_ptr.vmem [resolvable:$true] %s21_s27 }
   0x3   :  { %s492_s30 = scalar_lea.hbm %s710_s3, 1024 }
   0x4   :  { %p493_p0 = scmp.ne.s32.totalorder %s710_s3, %s492_s30  ;;  %p496_p1 = scmp.lt.u32.totalorder %s492_s30, %s710_s3 }
   0x6   :  { %p498_p2 = pnand %p496_p1, %p493_p0 }
   0x8   :  { %501 = shalt.err (!%p498_p2)
}
   0x9   :  { %s502_s12 = scalar_lea.vmem %s36_s25, 1024  ;;  %p507_p4 = scmp.lt.s32.totalorder %s36_s25, %s36_s25 }
   0xa   :  { %p503_p3 = scmp.ne.s32.totalorder %s36_s25, %s502_s12  ;;  %p508_p5 = scmp.lt.s32.totalorder %s502_s12, %s502_s12 }
   0xc   :  { %p509_p6 = por %p508_p5, %p507_p4 }
   0xe   :  { %p510_p7 = pnand %p509_p6, %p503_p3 }
  0x10   :  { %513 = shalt.err (!%p510_p7)
}
  0x11   :  { %s564_s13 = smov 64   ;;  %s565_s14 = smov 4  }
  0x12   :  { %41 = dma.hbm_to_vmem [thread:$0]  %s710_s3, 1024, %s36_s25, [#allocation5], %s564_s13, %s564_s13, %s565_s14  }
  0x13   :  { %s514_s19 = scalar_lea.hbm %s708_s1, 256 }
  0x14   :  { %p515_p8 = scmp.ne.s32.totalorder %s708_s1, %s514_s19  ;;  %p518_p9 = scmp.lt.u32.totalorder %s514_s19, %s708_s1 }
  0x16   :  { %p520_p10 = pnand %p518_p9, %p515_p8 }
  0x18   :  { %523 = shalt.err (!%p520_p10)
}
  0x19   :  { %s524_s24 = scalar_lea.vmem %s610_s27, 256  ;;  %p529_p12 = scmp.lt.s32.totalorder %s610_s27, %s610_s27 }
  0x1a   :  { %p525_p11 = scmp.ne.s32.totalorder %s610_s27, %s524_s24  ;;  %p530_p13 = scmp.lt.s32.totalorder %s524_s24, %s524_s24 }
  0x1c   :  { %p531_p0 = por %p530_p13, %p529_p12 }
  0x1e   :  { %p532_p1 = pnand %p531_p0, %p525_p11 }
  0x20   :  { %535 = shalt.err (!%p532_p1)
}
  0x21   :  { %27 = dma.hbm_to_vmem [thread:$0]  %s708_s1, 256, %s610_s27, [#allocation3], %s564_s13, %s564_s13, %s565_s14  }
  0x22   :  { %s566_s26 = smov [#allocation6]   ;;  %s536_s8 = scalar_lea.hbm %s712_s5, 1024 }
  0x23   :  { %s49_s28 = sshll.u32 %s566_s26, 4  ;;  %p537_p2 = scmp.ne.s32.totalorder %s712_s5, %s536_s8  ;;  %s50_s28 = int_to_ptr.vmem [resolvable:$true] %s49_s28 }
  0x24   :  { %p540_p3 = scmp.lt.u32.totalorder %s536_s8, %s712_s5 }
  0x26   :  { %p542_p4 = pnand %p540_p3, %p537_p2 }
  0x28   :  { %545 = shalt.err (!%p542_p4)
}
  0x29   :  { %s546_s15 = scalar_lea.vmem %s50_s28, 1024  ;;  %p551_p6 = scmp.lt.s32.totalorder %s50_s28, %s50_s28 }
  0x2a   :  { %p547_p5 = scmp.ne.s32.totalorder %s50_s28, %s546_s15  ;;  %p552_p7 = scmp.lt.s32.totalorder %s546_s15, %s546_s15 }
  0x2c   :  { %p553_p8 = por %p552_p7, %p551_p6 }
  0x2e   :  { %p554_p9 = pnand %p553_p8, %p547_p5 }
  0x30   :  { %557 = shalt.err (!%p554_p9)
}
  0x31   :  { %55 = dma.hbm_to_vmem [thread:$0]  %s712_s5, 1024, %s50_s28, [#allocation5], %s564_s13, %s564_s13, %s565_s14  }
  0x32   :  { %558 = dma.done.wait [#allocation3], 256  }
  0x33   :  { %559 = vsyncadd [#allocation3], 4294967040 }
  0x34   :  { %560 = dma.done.wait [#allocation5], 2048  }
  0x35   :  { %561 = vsyncadd [#allocation5], 4294965248  ;;  %v567_v0 = vmov 0.0   ;;  %vm568_vm0 = vmmov 0   ;;  %v474_v1 = vld [vmem:[#allocation2] sm:$0xff]   ;;  %v475_v2 = vld [vmem:[#allocation2 + $0x8] sm:$0xff]  }
  0x36   :  { %418 = vmatprep.subr.bf16.mxu0 %v567_v0  ;;  %422 = vmatprep.mubr.msk.bf16.mxu0 %vm568_vm0, %v567_v0  ;;  %v68_v3 = vld [vmem:[%s707_s0] sm:$0xff]  ;;  %v69_v4 = vld [vmem:[%s707_s0 + $0x8] sm:$0xff]  ;;  %v476_v5 = vld [vmem:[#allocation4] sm:$0xff]   ;;  %vm94_vm1 = vcmask 261120   ;;  %v569_v28 = vmov 0  }
  0x37   :  { %426 = vmatprep.subr.bf16.mxu1 %v567_v0  ;;  %442 = vmatprep.mubr.msk.bf16.mxu1 %vm568_vm0, %v567_v0  ;;  %v70_v6 = vpack.c.bf16 %v69_v4, %v68_v3  ;;  %v477_v7 = vld [vmem:[#allocation4 + $0x8] sm:$0xff]   ;;  %v478_v8 = vld [vmem:[#allocation4 + $0x10] sm:$0xff]   ;;  %v479_v9 = vld [vmem:[#allocation4 + $0x18] sm:$0xff]  }
  0x38   :  { %419 = vmatpush3.bf16.msra.mxu0 %v474_v1  ;;  %427 = vmatpush3.bf16.msra.mxu1 %v476_v5  ;;  %v480_v10 = vld [vmem:[#allocation4 + $0x20] sm:$0xff]   ;;  %v481_v11 = vld [vmem:[#allocation4 + $0x28] sm:$0xff]   ;;  %v482_v12 = vld [vmem:[#allocation4 + $0x30] sm:$0xff]  }
  0x39   :  { %420 = vmatprep.subr.bf16.mxu0 %v567_v0  ;;  %428 = vmatprep.subr.bf16.mxu1 %v567_v0  ;;  %v483_v13 = vld [vmem:[#allocation4 + $0x38] sm:$0xff]   ;;  %v484_v14 = vld [vmem:[#allocation6] sm:$0xff]   ;;  %v485_v15 = vld [vmem:[#allocation6 + $0x8] sm:$0xff]  }
  0x3a   :  { %v486_v16 = vld [vmem:[#allocation6 + $0x10] sm:$0xff]   ;;  %v487_v17 = vld [vmem:[#allocation6 + $0x18] sm:$0xff]   ;;  %v488_v18 = vld [vmem:[#allocation6 + $0x20] sm:$0xff]  }
  0x3b   :  { %v489_v19 = vld [vmem:[#allocation6 + $0x28] sm:$0xff]   ;;  %v375_v20 = vld [vmem:[%s709_s2] ss:$0 sm:$0xff]  ;;  %v491_v31 = vld [vmem:[#allocation6 + $0x38] sm:$0xff]  }
  0x3c   :  { %421 = vmatpush3.bf16.msra.mxu0 %v475_v2  ;;  %429 = vmatpush3.bf16.msra.mxu1 %v477_v7  ;;  %v490_v30 = vld [vmem:[#allocation6 + $0x30] sm:$0xff]  }
  0x3d   :  { %446 = vmatprep.subr.bf16.mxu0 %v567_v0  ;;  %430 = vmatprep.subr.bf16.mxu1 %v567_v0  ;;  %v379_v32 = vld [vmem:[%s711_s4] ss:$0 sm:$0xff] }
  0x3e   :  { %v388_v41 = vld [vmem:[%s713_s6] ss:$0 sm:$0xff] }
  0x3f   :  { %423 = vmatmul.mubr.msk.bf16.vlgmr.msra.gmra.mrb[0].mxu0 %vm94_vm1, %v70_v6 }
  0x40   :  { %462 = vmatprep.mubr.msk.bf16.mxu0 %vm568_vm0, %v567_v0  ;;  %431 = vmatpush3.bf16.msra.mxu1 %v478_v8 }
  0x41   :  { %432 = vmatprep.subr.bf16.mxu1 %v567_v0  ;;  %447 = vmatpush3.bf16.msra.mxu0 %v484_v14 }
  0x42   :  { %448 = vmatprep.subr.bf16.mxu0 %v567_v0 }
  0x44   :  { %433 = vmatpush3.bf16.msra.mxu1 %v479_v9 }
  0x45   :  { %434 = vmatprep.subr.bf16.mxu1 %v567_v0  ;;  %449 = vmatpush3.bf16.msra.mxu0 %v485_v15 }
  0x46   :  { %450 = vmatprep.subr.bf16.mxu0 %v567_v0 }
  0x48   :  { %435 = vmatpush3.bf16.msra.mxu1 %v480_v10 }
  0x49   :  { %436 = vmatprep.subr.bf16.mxu1 %v567_v0  ;;  %451 = vmatpush3.bf16.msra.mxu0 %v486_v16 }
  0x4a   :  { %452 = vmatprep.subr.bf16.mxu0 %v567_v0 }
  0x4c   :  { %437 = vmatpush3.bf16.msra.mxu1 %v481_v11 }
  0x4d   :  { %438 = vmatprep.subr.bf16.mxu1 %v567_v0  ;;  %453 = vmatpush3.bf16.msra.mxu0 %v487_v17 }
  0x4e   :  { %454 = vmatprep.subr.bf16.mxu0 %v567_v0 }
  0x50   :  { %439 = vmatpush3.bf16.msra.mxu1 %v482_v12 }
  0x51   :  { %440 = vmatprep.subr.bf16.mxu1 %v567_v0  ;;  %455 = vmatpush3.bf16.msra.mxu0 %v488_v18 }
  0x52   :  { %456 = vmatprep.subr.bf16.mxu0 %v567_v0 }
  0x54   :  { %441 = vmatpush3.bf16.msra.mxu1 %v483_v13 }
  0x55   :  { %457 = vmatpush3.bf16.msra.mxu0 %v489_v19 }
  0x56   :  { %458 = vmatprep.subr.bf16.mxu0 %v567_v0 }
  0x59   :  { %459 = vmatpush3.bf16.msra.mxu0 %v490_v30 }
  0x5a   :  { %460 = vmatprep.subr.bf16.mxu0 %v567_v0 }
  0x5d   :  { %461 = vmatpush3.bf16.msra.mxu0 %v491_v31 }
 0x112   :  { %v132_v21 = vpop.f32.mrb[0].mxu0 }
 0x113   :  { %v424_v22 = vpop.f32.mrb[1].mxu0  ;;  %v133_v24 = vadd.f32 %v375_v20, %v132_v21 }
 0x114   :  { %v135_v23 = vpop.f32.mrb[2].mxu0 }
 0x115   :  { %v136_v25 = vadd.f32 %v375_v20, %v135_v23  ;;  %v425_v26 = vpop.f32.mrb[3].mxu0 }
 0x117   :  { %v139_v27 = vpack.c.bf16 %v136_v25, %v133_v24 }
 0x119   :  { %v140_v29 = vmax.bf16 %v569_v28, %v139_v27 }
 0x11b   :  { %443 = vmatmul.mubr.bf16.vlgmr.msra.gmra.mrb[0].mxu1 %v140_v29 }
 0x1ee   :  { %v246_v33 = vpop.f32.mrb[0].mxu1 }
 0x1ef   :  { %v444_v34 = vpop.f32.mrb[1].mxu1  ;;  %v247_v36 = vadd.f32 %v379_v32, %v246_v33 }
 0x1f0   :  { %v249_v35 = vpop.f32.mrb[2].mxu1 }
 0x1f1   :  { %v250_v37 = vadd.f32 %v379_v32, %v249_v35  ;;  %v445_v38 = vpop.f32.mrb[3].mxu1 }
 0x1f3   :  { %v253_v39 = vpack.c.bf16 %v250_v37, %v247_v36 }
 0x1f5   :  { %v254_v40 = vmax.bf16 %v569_v28, %v253_v39 }
 0x1f7   :  { %463 = vmatmul.mubr.bf16.vlgmr.msra.gmra.mrb[4].mxu0 %v254_v40 }
 0x2ca   :  { %v360_v42 = vpop.f32.mrb[4].mxu0 }
 0x2cb   :  { %v361_v43 = vadd.f32 %v388_v41, %v360_v42  ;;  %v464_v44 = vpop.f32.mrb[5].mxu0 }
 0x2cc   :  { %v363_v45 = vpop.f32.mrb[6].mxu0 }
 0x2cd   :  { %367 = vst [vmem:[%s714_s7] sm:$0xff] %v361_v43  ;;  %v364_v46 = vadd.f32 %v388_v41, %v363_v45  ;;  %v465_v47 = vpop.f32.mrb[7].mxu0 }
 0x2cf   :  { %368 = vst [vmem:[%s714_s7 + $0x8] sm:$0xff] %v364_v46 }
 0x2d0   :  { %373 = vsyncpa [#allocation3], 1 }
 0x2d1   :  { %374 = vsyncpa [#allocation5], 1 }

</bundles_post_ra>
